<compile_context>
chip_gen: v7x
topology: tpu7x:2x2x1
jax: 0.10.0
libtpu: 0.0.40
codegen_flags: <defaults>
</compile_context>

<pallas_src>
import functools

import jax
import jax.numpy as jnp
from jax.experimental import pallas as pl
from jax.experimental.pallas import tpu as pltpu


F_PAD = 128  # lane-dense padded width for feature / projection dims


# ---------------------------------------------------------------------------
# Fused kernel: one grid step per augmented view (grid=(2,))
# ---------------------------------------------------------------------------

def simclr_fused_kernel(x_ref, w_enc_ref, w1_ref, w2_ref,
                        xnorm_ref, h_ref, loss_ref, z_scratch,
                        *, batch_size, channels, hw, mean, inv_std, inv_temp):
    # x_ref      : (B, C*HW)     raw images, same block for both views (1 DMA)
    # w_enc_ref  : (C, F_PAD)    synthetic encoder weight (zero-padded lanes)
    # w1/w2_ref  : (F_PAD,F_PAD) projector weights (zero-padded)
    # xnorm_ref  : (B, C*HW)     this view's block of cat([x_i, x_j])
    # h_ref      : (B, F_PAD)    this view's block of cat([h_i, h_j]) (padded)
    # loss_ref   : (1, 1)        written only on the last view
    # z_scratch  : (2B, F_PAD)   row-normalized projections, persists across views
    v = pl.program_id(0)
    fpad = w_enc_ref.shape[-1]

    # ---- Normalize (store) + GAP folded with the per-channel affine -----------
    # mean over HW commutes with (x - m_c) * inv_std_c, so pooled features come
    # straight from x and the normalized image never stays live past its store.
    h_pre = jnp.zeros((batch_size, fpad), jnp.float32)
    for c in range(channels):                              # static loop (C == 3)
        seg = x_ref[:, c * hw:(c + 1) * hw]                # (B, HW), lane-aligned
        xnorm_ref[:, c * hw:(c + 1) * hw] = (seg - mean[c]) * inv_std[c]
        pooled = jnp.mean(seg, axis=-1, keepdims=True)     # (B, 1)
        pn = (pooled - mean[c]) * inv_std[c]
        # K=3 contraction as VPU broadcast-FMAs (no tiny-K MXU matmul / relayout)
        h_pre = h_pre + pn * w_enc_ref[c:c + 1, :]
    h = jnp.maximum(h_pre, 0.0)                            # encoder Linear + ReLU
    h_ref[...] = h

    # ---- projector: Linear(F,F) -> ReLU -> Linear(F,P)  (128x128 MXU) ---------
    a = jnp.maximum(jnp.dot(h, w1_ref[...], preferred_element_type=jnp.float32), 0.0)
    z = jnp.dot(a, w2_ref[...], preferred_element_type=jnp.float32)

    # ---- cosine row-normalization, stash this view into the z scratch ---------
    inv_norm = jax.lax.rsqrt(
        jnp.maximum(jnp.sum(z * z, axis=-1, keepdims=True), 1e-16))   # EUP rsqrt
    zn = z * inv_norm
    row0 = pl.multiple_of(v * batch_size, batch_size)
    z_scratch[pl.ds(row0, batch_size), :] = zn

    # ---- NT-Xent once, on the last view, from the accumulated scratch ---------
    @pl.when(v == pl.num_programs(0) - 1)
    def _nt_xent():
        n2 = 2 * batch_size
        zn_all = z_scratch[...]                            # (2B, F_PAD), unit rows
        zl = zn_all * inv_temp                             # fold 1/temperature
        sim = jax.lax.dot_general(                         # (2B, 2B) cos-sim / temp
            zl, zn_all, (((1,), (1,)), ((), ())),
            preferred_element_type=jnp.float32)
        # positives: sim[i, B+i] == sim[B+i, i] -> rowwise products of the halves
        pos_half = jnp.sum(zl[:batch_size, :] * zn_all[batch_size:, :],
                           axis=-1, keepdims=True)         # (B, 1)
        row = jax.lax.broadcasted_iota(jnp.int32, (n2, n2), 0)
        col = jax.lax.broadcasted_iota(jnp.int32, (n2, n2), 1)
        # CE(label=0, [pos, negatives]) == -pos_i + logsumexp_{k != i} sim[i, k]
        masked = jnp.where(row == col, -jnp.inf, sim)
        m = jnp.max(masked, axis=-1, keepdims=True)
        lse = m + jnp.log(jnp.sum(jnp.exp(masked - m), axis=-1, keepdims=True))
        total = (jnp.sum(lse, axis=(0, 1), keepdims=True)
                 - 2.0 * jnp.sum(pos_half, axis=(0, 1), keepdims=True))
        # (1,1) VMEM output kept (rather than SMEM scalar) for lowering robustness
        # of the 2-D keepdims reductions; writeback happens once at grid end.
        loss_ref[...] = total / n2


# ---------------------------------------------------------------------------
# Model wrapper
# ---------------------------------------------------------------------------

class SimClrLearnerPallas:
    def __init__(self, key, batch_size, image_size=16, channels=3,
                 n_features=32, projection_dim=64, temperature=0.5):
        assert channels == 3, "Normalize() in the augmentation pipeline is 3-channel"
        assert n_features <= F_PAD and projection_dim <= F_PAD
        assert batch_size % 8 == 0, "per-view row blocks must be sublane (8) aligned"
        k1, k2, k3 = jax.random.split(key, 3)
        self.batch_size = batch_size
        self.image_size = image_size
        self.temperature = float(temperature)
        self.n_features = n_features
        self.projection_dim = projection_dim
        self.channels = channels

        # T.Normalize constants as compile-time Python scalars (multiply by 1/std)
        self.mean_rgb = (0.485, 0.456, 0.406)
        self.inv_std_rgb = tuple(1.0 / s for s in (0.229, 0.224, 0.225))

        # deterministic synthetic parameters, zero-padded to 128 lanes
        F, P = n_features, projection_dim
        w_enc = jax.random.normal(k1, (channels, F), jnp.float32) * 0.1
        w1 = jax.random.normal(k2, (F, F), jnp.float32) * (1.0 / F ** 0.5)
        w2 = jax.random.normal(k3, (F, P), jnp.float32) * (1.0 / F ** 0.5)
        self.w_enc = jnp.zeros((channels, F_PAD), jnp.float32).at[:, :F].set(w_enc)
        self.w1 = jnp.zeros((F_PAD, F_PAD), jnp.float32).at[:F, :F].set(w1)
        self.w2 = jnp.zeros((F_PAD, F_PAD), jnp.float32).at[:F, :P].set(w2)

        self._fwd = jax.jit(self._forward)

    # --- single fused forward pass ------------------------------------------
    def _forward(self, x):
        B, C, H, W = x.shape
        assert B == self.batch_size and C == self.channels
        HW = H * W
        CHW = C * HW
        FP = F_PAD
        n2 = 2 * B
        x_flat = x.reshape(B, CHW)          # lane-dense: channels folded into lanes

        kernel = functools.partial(
            simclr_fused_kernel,
            batch_size=B, channels=C, hw=HW,
            mean=self.mean_rgb, inv_std=self.inv_std_rgb,
            inv_temp=1.0 / self.temperature)

        # VMEM budget: double-buffered blocked inputs/outputs + weights + scratch,
        # 2x margin for compiler internal scratch; clamp to v7x physical (64 MiB).
        footprint = 4 * (2 * B * CHW            # x block (double-buffered)
                         + 2 * B * CHW          # xnorm out block
                         + 2 * B * FP           # h out block
                         + 2 * (8 * FP + 2 * FP * FP)   # weights (padded sublanes)
                         + n2 * FP + 128)       # z scratch + loss
        vmem_limit = min(max(2 * footprint, 8 << 20), 64 << 20)

        cost = pl.CostEstimate(
            flops=(4 * B * CHW                        # normalize (both views)
                   + 2 * (B * CHW + 2 * C * B * FP)   # pooling + encoder FMAs
                   + 8 * B * FP * FP                  # projector matmuls
                   + 2 * n2 * n2 * FP                 # similarity matmul
                   + 8 * n2 * n2),                    # masking / softmax elementwise
            transcendentals=n2 * n2 + 4 * n2,
            bytes_accessed=4 * (B * CHW + n2 * CHW + n2 * FP
                                + C * FP + 2 * FP * FP + 1))

        xnorm, h_pad, loss = pl.pallas_call(
            kernel,
            grid=(2,),  # view axis; x block index is view-invariant -> single DMA
            out_shape=(
                jax.ShapeDtypeStruct((n2, CHW), jnp.float32),   # cat([x_i, x_j])
                jax.ShapeDtypeStruct((n2, FP), jnp.float32),    # cat([h_i, h_j]) padded
                jax.ShapeDtypeStruct((1, 1), jnp.float32),      # NT-Xent loss
            ),
            in_specs=[
                pl.BlockSpec((B, CHW), lambda v: (0, 0)),       # x (read once)
                pl.BlockSpec((C, FP), lambda v: (0, 0)),        # w_enc
                pl.BlockSpec((FP, FP), lambda v: (0, 0)),       # w1
                pl.BlockSpec((FP, FP), lambda v: (0, 0)),       # w2
            ],
            out_specs=(
                pl.BlockSpec((B, CHW), lambda v: (v, 0)),       # per-view xnorm block
                pl.BlockSpec((B, FP), lambda v: (v, 0)),        # per-view h block
                pl.BlockSpec((1, 1), lambda v: (0, 0)),         # loss (written last)
            ),
            scratch_shapes=[pltpu.VMEM((n2, FP), jnp.float32)],  # z rows (both views)
            compiler_params=pltpu.CompilerParams(
                dimension_semantics=("arbitrary",),   # z scratch / loss carry across views
                vmem_limit_bytes=vmem_limit),
            cost_estimate=cost,
        )(x_flat, self.w_enc, self.w1, self.w2)

        h_cat = h_pad[:, :self.n_features]
        x_cat = xnorm.reshape(n2, C, H, W)
        return loss[0, 0], h_cat, None, x_cat

    def __call__(self, x):
        return self._fwd(x)


# ---------------------------------------------------------------------------
# Pure-JAX reference of the same deterministic forward (validation only)
# ---------------------------------------------------------------------------

def reference_forward(x, model):
    B, C, H, W = x.shape
    mean = jnp.array(model.mean_rgb, jnp.float32).reshape(1, C, 1, 1)
    inv_std = jnp.array(model.inv_std_rgb, jnp.float32).reshape(1, C, 1, 1)
    xn = (x - mean) * inv_std
    F, P = model.n_features, model.projection_dim
    pooled = xn.mean(axis=(2, 3))                                     # (B, C)
    h = jnp.maximum(pooled @ model.w_enc[:, :F], 0.0)                 # (B, F)
    z = jnp.maximum(h @ model.w1[:F, :F], 0.0) @ model.w2[:F, :P]     # (B, P)
    z2 = jnp.concatenate([z, z], axis=0)
    zn = z2 * jax.lax.rsqrt(jnp.maximum(jnp.sum(z2 * z2, -1, keepdims=True), 1e-16))
    sim = (zn @ zn.T) / model.temperature
    n2 = 2 * B
    idx = jnp.arange(n2)
    pair = jnp.where(idx < B, idx + B, idx - B)
    pos = sim[idx, pair]
    masked = jnp.where(jnp.eye(n2, dtype=bool), -jnp.inf, sim)
    lse = jax.nn.logsumexp(masked, axis=-1)
    loss = jnp.sum(lse - pos) / n2
    return loss, jnp.concatenate([h, h], axis=0), jnp.concatenate([xn, xn], axis=0)


# ---------------------------------------------------------------------------
# Main
# ---------------------------------------------------------------------------

if __name__ == "__main__":
    key = jax.random.PRNGKey(0)
    kx, kp = jax.random.split(key)

    B, C, H, W = 8, 3, 16, 16
    x = jax.random.uniform(kx, (B, C, H, W), dtype=jnp.float32)

    model = SimClrLearnerPallas(kp, batch_size=B, image_size=H, channels=C,
                                n_features=32, projection_dim=64, temperature=0.5)

    loss, h_cat, _, x_cat = model(x)
    jax.block_until_ready((loss, h_cat, x_cat))

    assert loss.shape == ()
    assert h_cat.shape == (2 * B, 32)
    assert x_cat.shape == (2 * B, C, H, W)

    ref_loss, ref_h, ref_x = reference_forward(x, model)
    assert bool(jnp.isfinite(loss))
    assert jnp.allclose(x_cat, ref_x, atol=1e-5, rtol=1e-5)
    assert jnp.allclose(h_cat, ref_h, atol=1e-4, rtol=1e-3)
    assert jnp.allclose(loss, ref_loss, atol=1e-4, rtol=1e-4)

    print("KERNEL_OK")
</pallas_src>

<mosaic_0001>
module attributes {stable_mosaic.version = 11 : i64} {
  func.func @simclr_fused_kernel(%arg0: i32, %arg1: memref<8x768xf32, #tpu.memory_space<vmem>>, %arg2: memref<3x128xf32, #tpu.memory_space<vmem>>, %arg3: memref<128x128xf32, #tpu.memory_space<vmem>>, %arg4: memref<128x128xf32, #tpu.memory_space<vmem>>, %arg5: memref<8x768xf32, #tpu.memory_space<vmem>>, %arg6: memref<8x128xf32, #tpu.memory_space<vmem>>, %arg7: memref<1x1xf32, #tpu.memory_space<vmem>>, %arg8: memref<16x128xf32, #tpu.memory_space<vmem>>) attributes {dimension_semantics = [#tpu.dimension_semantics<arbitrary>], iteration_bounds = array<i64: 2>, scalar_prefetch = 0 : i64, scratch_operands = 1 : i64, tpu.core_type = #tpu.core_type<tc>, window_params = [{pipeline_mode = #tpu.pipeline_mode<synchronous>, transform_indices = @transform_0, window_bounds = array<i64: 8, 768>}, {pipeline_mode = #tpu.pipeline_mode<synchronous>, transform_indices = @transform_1, window_bounds = array<i64: 3, 128>}, {pipeline_mode = #tpu.pipeline_mode<synchronous>, transform_indices = @transform_2, window_bounds = array<i64: 128, 128>}, {pipeline_mode = #tpu.pipeline_mode<synchronous>, transform_indices = @transform_3, window_bounds = array<i64: 128, 128>}, {transform_indices = @transform_4, window_bounds = array<i64: 8, 768>}, {transform_indices = @transform_5, window_bounds = array<i64: 8, 128>}, {pipeline_mode = #tpu.pipeline_mode<synchronous>, transform_indices = @transform_6, window_bounds = array<i64: 1, 1>}]} {
    %cst = arith.constant 0.000000e+00 : f32
    %0 = vector.broadcast %cst : f32 to vector<8x128xf32>
    %c0 = arith.constant 0 : index
    %c0_0 = arith.constant 0 : index
    %1 = vector.load %arg1[%c0, %c0_0] : memref<8x768xf32, #tpu.memory_space<vmem>>, vector<8x256xf32>
    %cst_1 = arith.constant 4.850000e-01 : f32
    %2 = vector.broadcast %cst_1 : f32 to vector<8x256xf32>
    %3 = arith.subf %1, %2 : vector<8x256xf32>
    %cst_2 = arith.constant 4.36681223 : f32
    %4 = vector.broadcast %cst_2 : f32 to vector<8x256xf32>
    %5 = arith.mulf %3, %4 : vector<8x256xf32>
    %c0_3 = arith.constant 0 : index
    %c0_4 = arith.constant 0 : index
    %6 = vector.load %arg5[%c0_3, %c0_4] : memref<8x768xf32, #tpu.memory_space<vmem>>, vector<8x256xf32>
    tpu.vector_store %arg5[%c0_3, %c0_4], %5 {strides = array<i32>} : memref<8x768xf32, #tpu.memory_space<vmem>>, vector<8x256xf32>,
    %cst_5 = arith.constant dense<0.000000e+00> : vector<8xf32>
    %7 = vector.multi_reduction <add>, %1, %cst_5 [1] : vector<8x256xf32> to vector<8xf32>
    %8 = vector.shape_cast %7 : vector<8xf32> to vector<8x1xf32>
    %cst_6 = arith.constant 2.560000e+02 : f32
    %9 = vector.broadcast %cst_6 : f32 to vector<8x1xf32>
    %10 = arith.divf %8, %9 : vector<8x1xf32>
    %cst_7 = arith.constant 4.850000e-01 : f32
    %11 = vector.broadcast %cst_7 : f32 to vector<8x1xf32>
    %12 = arith.subf %10, %11 : vector<8x1xf32>
    %cst_8 = arith.constant 4.36681223 : f32
    %13 = vector.broadcast %cst_8 : f32 to vector<8x1xf32>
    %14 = arith.mulf %12, %13 : vector<8x1xf32>
    %c0_9 = arith.constant 0 : index
    %c0_10 = arith.constant 0 : index
    %15 = vector.load %arg2[%c0_9, %c0_10] : memref<3x128xf32, #tpu.memory_space<vmem>>, vector<1x128xf32>
    %16 = vector.broadcast %14 : vector<8x1xf32> to vector<8x128xf32>
    %17 = vector.broadcast %15 : vector<1x128xf32> to vector<8x128xf32>
    %18 = arith.mulf %16, %17 : vector<8x128xf32>
    %19 = arith.addf %0, %18 : vector<8x128xf32>
    %c0_11 = arith.constant 0 : index
    %c256 = arith.constant 256 : index
    %20 = vector.load %arg1[%c0_11, %c256] : memref<8x768xf32, #tpu.memory_space<vmem>>, vector<8x256xf32>
    %cst_12 = arith.constant 4.560000e-01 : f32
    %21 = vector.broadcast %cst_12 : f32 to vector<8x256xf32>
    %22 = arith.subf %20, %21 : vector<8x256xf32>
    %cst_13 = arith.constant 4.46428585 : f32
    %23 = vector.broadcast %cst_13 : f32 to vector<8x256xf32>
    %24 = arith.mulf %22, %23 : vector<8x256xf32>
    %c0_14 = arith.constant 0 : index
    %c256_15 = arith.constant 256 : index
    %25 = vector.load %arg5[%c0_14, %c256_15] : memref<8x768xf32, #tpu.memory_space<vmem>>, vector<8x256xf32>
    tpu.vector_store %arg5[%c0_14, %c256_15], %24 {strides = array<i32>} : memref<8x768xf32, #tpu.memory_space<vmem>>, vector<8x256xf32>,
    %cst_16 = arith.constant dense<0.000000e+00> : vector<8xf32>
    %26 = vector.multi_reduction <add>, %20, %cst_16 [1] : vector<8x256xf32> to vector<8xf32>
    %27 = vector.shape_cast %26 : vector<8xf32> to vector<8x1xf32>
    %cst_17 = arith.constant 2.560000e+02 : f32
    %28 = vector.broadcast %cst_17 : f32 to vector<8x1xf32>
    %29 = arith.divf %27, %28 : vector<8x1xf32>
    %cst_18 = arith.constant 4.560000e-01 : f32
    %30 = vector.broadcast %cst_18 : f32 to vector<8x1xf32>
    %31 = arith.subf %29, %30 : vector<8x1xf32>
    %cst_19 = arith.constant 4.46428585 : f32
    %32 = vector.broadcast %cst_19 : f32 to vector<8x1xf32>
    %33 = arith.mulf %31, %32 : vector<8x1xf32>
    %c1 = arith.constant 1 : index
    %c0_20 = arith.constant 0 : index
    %34 = vector.load %arg2[%c1, %c0_20] : memref<3x128xf32, #tpu.memory_space<vmem>>, vector<1x128xf32>
    %35 = vector.broadcast %33 : vector<8x1xf32> to vector<8x128xf32>
    %36 = vector.broadcast %34 : vector<1x128xf32> to vector<8x128xf32>
    %37 = arith.mulf %35, %36 : vector<8x128xf32>
    %38 = arith.addf %19, %37 : vector<8x128xf32>
    %c0_21 = arith.constant 0 : index
    %c512 = arith.constant 512 : index
    %39 = vector.load %arg1[%c0_21, %c512] : memref<8x768xf32, #tpu.memory_space<vmem>>, vector<8x256xf32>
    %cst_22 = arith.constant 4.060000e-01 : f32
    %40 = vector.broadcast %cst_22 : f32 to vector<8x256xf32>
    %41 = arith.subf %39, %40 : vector<8x256xf32>
    %cst_23 = arith.constant 4.44444466 : f32
    %42 = vector.broadcast %cst_23 : f32 to vector<8x256xf32>
    %43 = arith.mulf %41, %42 : vector<8x256xf32>
    %c0_24 = arith.constant 0 : index
    %c512_25 = arith.constant 512 : index
    %44 = vector.load %arg5[%c0_24, %c512_25] : memref<8x768xf32, #tpu.memory_space<vmem>>, vector<8x256xf32>
    tpu.vector_store %arg5[%c0_24, %c512_25], %43 {strides = array<i32>} : memref<8x768xf32, #tpu.memory_space<vmem>>, vector<8x256xf32>,
    %cst_26 = arith.constant dense<0.000000e+00> : vector<8xf32>
    %45 = vector.multi_reduction <add>, %39, %cst_26 [1] : vector<8x256xf32> to vector<8xf32>
    %46 = vector.shape_cast %45 : vector<8xf32> to vector<8x1xf32>
    %cst_27 = arith.constant 2.560000e+02 : f32
    %47 = vector.broadcast %cst_27 : f32 to vector<8x1xf32>
    %48 = arith.divf %46, %47 : vector<8x1xf32>
    %cst_28 = arith.constant 4.060000e-01 : f32
    %49 = vector.broadcast %cst_28 : f32 to vector<8x1xf32>
    %50 = arith.subf %48, %49 : vector<8x1xf32>
    %cst_29 = arith.constant 4.44444466 : f32
    %51 = vector.broadcast %cst_29 : f32 to vector<8x1xf32>
    %52 = arith.mulf %50, %51 : vector<8x1xf32>
    %c2 = arith.constant 2 : index
    %c0_30 = arith.constant 0 : index
    %53 = vector.load %arg2[%c2, %c0_30] : memref<3x128xf32, #tpu.memory_space<vmem>>, vector<1x128xf32>
    %54 = vector.broadcast %52 : vector<8x1xf32> to vector<8x128xf32>
    %55 = vector.broadcast %53 : vector<1x128xf32> to vector<8x128xf32>
    %56 = arith.mulf %54, %55 : vector<8x128xf32>
    %57 = arith.addf %38, %56 : vector<8x128xf32>
    %cst_31 = arith.constant 0.000000e+00 : f32
    %58 = vector.broadcast %cst_31 : f32 to vector<8x128xf32>
    %59 = arith.maximumf %57, %58 : vector<8x128xf32>
    %c0_32 = arith.constant 0 : index
    %c0_33 = arith.constant 0 : index
    %60 = vector.load %arg6[%c0_32, %c0_33] : memref<8x128xf32, #tpu.memory_space<vmem>>, vector<8x128xf32>
    tpu.vector_store %arg6[%c0_32, %c0_33], %59 {strides = array<i32>} : memref<8x128xf32, #tpu.memory_space<vmem>>, vector<8x128xf32>,
    %c0_34 = arith.constant 0 : index
    %c0_35 = arith.constant 0 : index
    %61 = vector.load %arg3[%c0_34, %c0_35] : memref<128x128xf32, #tpu.memory_space<vmem>>, vector<128x128xf32>
    %cst_36 = arith.constant dense<0.000000e+00> : vector<8x128xf32>
    %62 = tpu.matmul %59, %61, %cst_36 {dimension_numbers = #tpu.dot_dimension_numbers<[1], [0], [0], [1], [0, 0, 1, 1], [], []>} : vector<8x128xf32>, vector<128x128xf32>, vector<8x128xf32> -> vector<8x128xf32>
    %cst_37 = arith.constant 0.000000e+00 : f32
    %63 = vector.broadcast %cst_37 : f32 to vector<8x128xf32>
    %64 = arith.maximumf %62, %63 : vector<8x128xf32>
    %c0_38 = arith.constant 0 : index
    %c0_39 = arith.constant 0 : index
    %65 = vector.load %arg4[%c0_38, %c0_39] : memref<128x128xf32, #tpu.memory_space<vmem>>, vector<128x128xf32>
    %cst_40 = arith.constant dense<0.000000e+00> : vector<8x128xf32>
    %66 = tpu.matmul %64, %65, %cst_40 {dimension_numbers = #tpu.dot_dimension_numbers<[1], [0], [0], [1], [0, 0, 1, 1], [], []>} : vector<8x128xf32>, vector<128x128xf32>, vector<8x128xf32> -> vector<8x128xf32>
    %67 = arith.mulf %66, %66 : vector<8x128xf32>
    %cst_41 = arith.constant dense<0.000000e+00> : vector<8xf32>
    %68 = vector.multi_reduction <add>, %67, %cst_41 [1] : vector<8x128xf32> to vector<8xf32>
    %69 = vector.shape_cast %68 : vector<8xf32> to vector<8x1xf32>
    %cst_42 = arith.constant 1.000000e-16 : f32
    %70 = vector.broadcast %cst_42 : f32 to vector<8x1xf32>
    %71 = arith.maximumf %69, %70 : vector<8x1xf32>
    %72 = math.rsqrt %71 : vector<8x1xf32>
    %73 = vector.broadcast %72 : vector<8x1xf32> to vector<8x128xf32>
    %74 = arith.mulf %66, %73 : vector<8x128xf32>
    %c8_i32 = arith.constant 8 : i32
    %75 = arith.muli %arg0, %c8_i32 : i32
    %76 = tpu.assume_multiple %75, 8 : i32
    %77 = arith.index_cast %76 : i32 to index
    %c0_43 = arith.constant 0 : index
    %78 = vector.load %arg8[%77, %c0_43] : memref<16x128xf32, #tpu.memory_space<vmem>>, vector<8x128xf32>
    tpu.vector_store %arg8[%77, %c0_43], %74 {strides = array<i32>} : memref<16x128xf32, #tpu.memory_space<vmem>>, vector<8x128xf32>,
    %c1_i32 = arith.constant 1 : i32
    %79 = arith.cmpi eq, %arg0, %c1_i32 : i32
    %80 = arith.extui %79 : i1 to i32
    %c0_i32 = arith.constant 0 : i32
    %81 = arith.cmpi ne, %80, %c0_i32 : i32
    scf.if %81 {
      %c0_44 = arith.constant 0 : index
      %c0_45 = arith.constant 0 : index
      %82 = vector.load %arg8[%c0_44, %c0_45] : memref<16x128xf32, #tpu.memory_space<vmem>>, vector<16x128xf32>
      %cst_46 = arith.constant 2.000000e+00 : f32
      %83 = vector.broadcast %cst_46 : f32 to vector<16x128xf32>
      %84 = arith.mulf %82, %83 : vector<16x128xf32>
      %cst_47 = arith.constant dense<0.000000e+00> : vector<16x16xf32>
      %85 = tpu.matmul %84, %82, %cst_47 {dimension_numbers = #tpu.dot_dimension_numbers<[1], [1], [0], [0], [0, 0, 1, 0], [], []>} : vector<16x128xf32>, vector<16x128xf32>, vector<16x16xf32> -> vector<16x16xf32>
      %86 = vector.extract_strided_slice %84 {offsets = [0, 0], sizes = [8, 128], strides = [1, 1]} : vector<16x128xf32> to vector<8x128xf32>
      %87 = vector.extract_strided_slice %82 {offsets = [8, 0], sizes = [8, 128], strides = [1, 1]} : vector<16x128xf32> to vector<8x128xf32>
      %88 = arith.mulf %86, %87 : vector<8x128xf32>
      %cst_48 = arith.constant dense<0.000000e+00> : vector<8xf32>
      %89 = vector.multi_reduction <add>, %88, %cst_48 [1] : vector<8x128xf32> to vector<8xf32>
      %90 = vector.shape_cast %89 : vector<8xf32> to vector<8x1xf32>
      %91 = tpu.iota {dimensions = array<i32: 0>} : vector<16x16xi32>
      %92 = tpu.iota {dimensions = array<i32: 1>} : vector<16x16xi32>
      %93 = arith.cmpi eq, %91, %92 : vector<16x16xi32>
      %cst_49 = arith.constant 0xFF800000 : f32
      %94 = vector.broadcast %cst_49 : f32 to vector<16x16xf32>
      %95 = arith.select %93, %94, %85 : vector<16x16xi1>, vector<16x16xf32>
      %cst_50 = arith.constant dense<0xFF800000> : vector<16xf32>
      %96 = vector.multi_reduction <maximumf>, %95, %cst_50 [1] : vector<16x16xf32> to vector<16xf32>
      %97 = vector.shape_cast %96 : vector<16xf32> to vector<16x1xf32>
      %98 = vector.broadcast %97 : vector<16x1xf32> to vector<16x16xf32>
      %99 = arith.subf %95, %98 : vector<16x16xf32>
      %100 = math.exp %99 : vector<16x16xf32>
      %cst_51 = arith.constant dense<0.000000e+00> : vector<16xf32>
      %101 = vector.multi_reduction <add>, %100, %cst_51 [1] : vector<16x16xf32> to vector<16xf32>
      %102 = vector.shape_cast %101 : vector<16xf32> to vector<16x1xf32>
      %103 = math.log %102 : vector<16x1xf32>
      %104 = arith.addf %97, %103 : vector<16x1xf32>
      %105 = vector.shape_cast %104 : vector<16x1xf32> to vector<1x16x1xf32>
      %cst_52 = arith.constant dense<0.000000e+00> : vector<1xf32>
      %106 = vector.multi_reduction <add>, %105, %cst_52 [1, 2] : vector<1x16x1xf32> to vector<1xf32>
      %107 = vector.shape_cast %106 : vector<1xf32> to vector<1x1x1xf32>
      %108 = vector.extract %107[0, 0, 0] : f32 from vector<1x1x1xf32>
      %109 = vector.broadcast %108 : f32 to vector<1x1xf32>
      %110 = vector.shape_cast %90 : vector<8x1xf32> to vector<1x8x1xf32>
      %cst_53 = arith.constant dense<0.000000e+00> : vector<1xf32>
      %111 = vector.multi_reduction <add>, %110, %cst_53 [1, 2] : vector<1x8x1xf32> to vector<1xf32>
      %112 = vector.shape_cast %111 : vector<1xf32> to vector<1x1x1xf32>
      %113 = vector.extract %112[0, 0, 0] : f32 from vector<1x1x1xf32>
      %114 = vector.broadcast %113 : f32 to vector<1x1xf32>
      %cst_54 = arith.constant 2.000000e+00 : f32
      %115 = vector.broadcast %cst_54 : f32 to vector<1x1xf32>
      %116 = arith.mulf %115, %114 : vector<1x1xf32>
      %117 = arith.subf %109, %116 : vector<1x1xf32>
      %cst_55 = arith.constant 1.600000e+01 : f32
      %118 = vector.broadcast %cst_55 : f32 to vector<1x1xf32>
      %119 = arith.divf %117, %118 : vector<1x1xf32>
      %c0_56 = arith.constant 0 : index
      %c0_57 = arith.constant 0 : index
      %120 = vector.load %arg7[%c0_56, %c0_57] : memref<1x1xf32, #tpu.memory_space<vmem>>, vector<1x1xf32>
      tpu.vector_store %arg7[%c0_56, %c0_57], %119 {strides = array<i32>} : memref<1x1xf32, #tpu.memory_space<vmem>>, vector<1x1xf32>,
    } else {
    }
    return
  }
  func.func @transform_0(%arg0: i32) -> (i32, i32) {
    %c0_i32 = arith.constant 0 : i32
    %c0_i32_0 = arith.constant 0 : i32
    %c0_i32_1 = arith.constant 0 : i32
    return %c0_i32, %c0_i32_0 : i32, i32
  }
  func.func @transform_1(%arg0: i32) -> (i32, i32) {
    %c0_i32 = arith.constant 0 : i32
    %c0_i32_0 = arith.constant 0 : i32
    %c0_i32_1 = arith.constant 0 : i32
    return %c0_i32, %c0_i32_0 : i32, i32
  }
  func.func @transform_2(%arg0: i32) -> (i32, i32) {
    %c0_i32 = arith.constant 0 : i32
    %c0_i32_0 = arith.constant 0 : i32
    %c0_i32_1 = arith.constant 0 : i32
    return %c0_i32, %c0_i32_0 : i32, i32
  }
  func.func @transform_3(%arg0: i32) -> (i32, i32) {
    %c0_i32 = arith.constant 0 : i32
    %c0_i32_0 = arith.constant 0 : i32
    %c0_i32_1 = arith.constant 0 : i32
    return %c0_i32, %c0_i32_0 : i32, i32
  }
  func.func @transform_4(%arg0: i32) -> (i32, i32) {
    %c0_i32 = arith.constant 0 : i32
    %c0_i32_0 = arith.constant 0 : i32
    return %arg0, %c0_i32 : i32, i32
  }
  func.func @transform_5(%arg0: i32) -> (i32, i32) {
    %c0_i32 = arith.constant 0 : i32
    %c0_i32_0 = arith.constant 0 : i32
    return %arg0, %c0_i32 : i32, i32
  }
  func.func @transform_6(%arg0: i32) -> (i32, i32) {
    %c0_i32 = arith.constant 0 : i32
    %c0_i32_0 = arith.constant 0 : i32
    %c0_i32_1 = arith.constant 0 : i32
    return %c0_i32, %c0_i32_0 : i32, i32
  }
}

</mosaic_0001>

<bundles_post_ra>
// kernel: _forward.1
= control target key start
LH: loop header
LB: loop body
LE: loop exit
PB: predicated region body
PF: predicated region fallthrough
CT: control target
= control target key end

     0   :  { %12 = vsyncpa [#allocation4], 0  ;;  %s1422_s0 = inlined_call_operand.vmem [shape: f32[8,768], index: 0, kind: input, shape index: {}]   ;;  %s1423_s1 = inlined_call_operand.vmem [shape: f32[3,128], index: 1, kind: input, shape index: {}]   ;;  %s1424_s2 = inlined_call_operand.vmem [shape: f32[128,128], index: 2, kind: input, shape index: {}]   ;;  %s1425_s3 = inlined_call_operand.vmem [shape: f32[128,128], index: 3, kind: input, shape index: {}]   ;;  %s1426_s4 = inlined_call_operand.vmem [shape: f32[16,768], index: 4, kind: output, shape index: {0}]   ;;  %s1427_s5 = inlined_call_operand.hbm [shape: f32[16,128], index: 5, kind: output, shape index: {1}]   ;;  %s1428_s6 = inlined_call_operand.hbm [shape: f32[1,1], index: 6, kind: output, shape index: {2}]  }
   0x1   :  { %14 = vsyncpa [#allocation4 + $0x1], 0 }
   0x2   :  { %15 = vsyncpa [#allocation6], 0  ;;  %s1148_s21 = smov 0   ;;  %s1150_s22 = smov 0  }
   0x3   :  { %s1152_s23 = smov 0   ;;  %s1154_s24 = smov 0  }
   0x4 LB: > { %s1169_s25 = sadd.s32 4294967295, %s1106_s24   ;;  %s758_s26 = sadd.s32 4294967294, %s1106_s24   ;;  %s1106_s24 = sphi %s1154_s24, %s1434_s24   ;;  %s1102_s23 = sphi %s1152_s23, %s1433_s23   ;;  %s1098_s22 = sphi %s1150_s22, %s1432_s22   ;;  %s1094_s21 = sphi %s1148_s21, %s1431_s21  }
   0x5   : > { %s1173_s27 = sadd.s32 1, %s1106_s24   ;;  %s138_s28 = sadd.s32 1, %s1102_s23 }
   0x6   : > { %s135_s29 = ssub.s32 %s1106_s24, %s1173_s27  ;;  %p148_p0 = scmp.ne.s32.totalorder %s1102_s23, %s1098_s22 }
   0x7   : > { %p136_p1 = scmp.eq.s32.totalorder %s135_s29, 0  ;;  %p149_p2 = scmp.eq.s32.totalorder %s1169_s25, 1 }
   0x8   : > { %p154_p3 = scmp.ne.s32.totalorder %s1098_s22, %s1094_s21  ;;  %p155_p4 = scmp.eq.s32.totalorder %s758_s26, 1 }
   0x9   : > { %s1184_s30 = scalar_select %p136_p1, %s1102_s23, %s138_s28  }
   0xa   : > { %p1188_p5 = por %p149_p2, %p148_p0  ;;  %p1192_p6 = por %p155_p4, %p154_p3 }
   0xb   : > { %p760_p7 = scmp.ge.s32.totalorder %s1106_s24, 1  ;;  %p206_p8 = scmp.lt.s32.totalorder %s1106_s24, 3 }
   0xd   : > { %p207_p9 = pnand %p760_p7, %p206_p8 }
   0xe   : > { %v241_v0 = vld [vmem:[%s1422_s0] sm:$0xff] (!%p207_p9)  ;;  %v242_v1 = vld [vmem:[%s1422_s0 + $0x8] sm:$0xff] (!%p207_p9)  ;;  %p236_p10 = scmp.lt.s32.totalorder (!%p207_p9), %s1169_s25, 1  ;;  %v263_v2 = vld [vmem:[%s1422_s0 + $0x10] sm:$0xff] (!%p207_p9)  ;;  %v1108_v8 = vmov (!%p207_p9), 0.0|0.0   ;;  %vm1109_vm0 = vmmov (!%p207_p9), 0  }
   0xf   : > { %210 = sbr.rel (%p207_p9) target bundleno = 1579 (0x62b), region = 36  ;;  %v764_v3 = vadd.f32 (!%p207_p9), -0.485, %v242_v1  ;;  %v249_v4 = vadd.f32 (!%p207_p9), %v242_v1, %v241_v0  ;;  %v763_v5 = vadd.f32 (!%p207_p9), -0.485, %v241_v0  ;;  %v264_v6 = vld [vmem:[%s1422_s0 + $0x18] sm:$0xff] (!%p207_p9)  ;;  %898 = vmatprep.subr.bf16.mxu0 (!%p207_p9), %v1108_v8  ;;  %922 = vmatprep.subr.bf16.mxu1 (!%p207_p9), %v1108_v8 }
  0x10   : > { %v284_v7 = vld [vmem:[%s1422_s0 + $0x20] sm:$0xff] (!%p207_p9)  ;;  %v767_v9 = vadd.f32 (!%p207_p9), -0.456, %v263_v2  ;;  %v768_v10 = vadd.f32 (!%p207_p9), -0.456, %v264_v6  ;;  %v271_v11 = vadd.f32 (!%p207_p9), %v264_v6, %v263_v2  ;;  %v285_v12 = vld [vmem:[%s1422_s0 + $0x28] sm:$0xff] (!%p207_p9) }
  0x11   : > { %v246_v13 = vmul.f32 (!%p207_p9), 4.366812, %v764_v3  ;;  %250 = vadd.xlane.f32.xlu0 (!%p207_p9), %v249_v4  ;;  %v245_v14 = vmul.f32 (!%p207_p9), 4.366812, %v763_v5  ;;  %v772_v15 = vadd.f32 (!%p207_p9), -0.406, %v285_v12  ;;  %v292_v16 = vadd.f32 (!%p207_p9), %v285_v12, %v284_v7 }
  0x12   : > { %v267_v17 = vmul.f32 (!%p207_p9), 4.464286, %v767_v9  ;;  %v268_v18 = vmul.f32 (!%p207_p9), 4.464286, %v768_v10  ;;  %v307_v19 = vld [vmem:[%s1424_s2] sm:$0xff] (!%p207_p9)  ;;  %v308_v22 = vld [vmem:[%s1424_s2 + $0x8] sm:$0xff] (!%p207_p9) }
  0x13   : > { %v289_v20 = vmul.f32 (!%p207_p9), 4.4444447, %v772_v15  ;;  %293 = vadd.xlane.f32.xlu1 (!%p207_p9), %v292_v16  ;;  %v771_v21 = vadd.f32 (!%p207_p9), -0.406, %v284_v7  ;;  %v309_v23 = vld [vmem:[%s1424_s2 + $0x10] sm:$0xff] (!%p207_p9)  ;;  %v899_v24 = vpack.c.bf16 (!%p207_p9), %v308_v22, %v307_v19  ;;  %v310_v25 = vld [vmem:[%s1424_s2 + $0x18] sm:$0xff] (!%p207_p9) }
  0x14   : > { %v902_v27 = vpack.c.bf16 (!%p207_p9), %v310_v25, %v309_v23  ;;  %v311_v28 = vld [vmem:[%s1424_s2 + $0x20] sm:$0xff] (!%p207_p9)  ;;  %v312_v29 = vld [vmem:[%s1424_s2 + $0x28] sm:$0xff] (!%p207_p9)  ;;  %v313_v31 = vld [vmem:[%s1424_s2 + $0x30] sm:$0xff] (!%p207_p9)  ;;  %v1110_v45 = vmov (!%p207_p9), 0.0   ;;  %s231_s17 = sand.u32 (!%p207_p9), 1, %s1098_s22   ;;  %s775_s9 = sshll.u32 (!%p207_p9), %s1169_s25, 3 }
  0x15   : > { %272 = vadd.xlane.f32.xlu0 (!%p207_p9), %v271_v11  ;;  %v288_v26 = vmul.f32 (!%p207_p9), 4.4444447, %v771_v21  ;;  %900 = vmatpush3.bf16.msra.mxu0 (!%p207_p9), %v899_v24  ;;  %v905_v30 = vpack.c.bf16 (!%p207_p9), %v312_v29, %v311_v28  ;;  %v314_v32 = vld [vmem:[%s1424_s2 + $0x38] sm:$0xff] (!%p207_p9)  ;;  %v315_v34 = vld [vmem:[%s1424_s2 + $0x40] sm:$0xff] (!%p207_p9)  ;;  %v316_v35 = vld [vmem:[%s1424_s2 + $0x48] sm:$0xff] (!%p207_p9)  ;;  %s1339_s18 = sshll.u32 (!%p207_p9), %s231_s17, 3 }
  0x16   : > { %s237_s19 = scalar_select %p236_p10, %s1169_s25, 1  ;;  %901 = vmatprep.subr.bf16.mxu0 %v1108_v8  ;;  %v908_v33 = vpack.c.bf16 %v314_v32, %v313_v31  ;;  %v911_v36 = vpack.c.bf16 %v316_v35, %v315_v34  ;;  %v317_v37 = vld [vmem:[%s1424_s2 + $0x50] sm:$0xff]  ;;  %v318_v38 = vld [vmem:[%s1424_s2 + $0x58] sm:$0xff]  ;;  %v319_v40 = vld [vmem:[%s1424_s2 + $0x60] sm:$0xff]  ;;  %853 = vmatprep.mubr.msk.f32.mxu0 %vm1109_vm0, %v1110_v45 }
  0x17   : > { %v914_v39 = vpack.c.bf16 %v318_v38, %v317_v37  ;;  %v320_v41 = vld [vmem:[%s1424_s2 + $0x68] sm:$0xff]  ;;  %v321_v43 = vld [vmem:[%s1424_s2 + $0x70] sm:$0xff]  ;;  %v322_v44 = vld [vmem:[%s1424_s2 + $0x78] sm:$0xff]  ;;  %888 = vmatprep.mubr.msk.f32.mxu1 %vm1109_vm0, %v1110_v45  ;;  %s487_s10 = scalar_lea.vmem [#allocation2], %s775_s9  ;;  %p776_p11 = scmp.ne.s32.totalorder %s1169_s25, 1 }
  0x18   : > { %s950_s28 = smul.u32 48, %s237_s19  ;;  %v917_v42 = vpack.c.bf16 %v320_v41, %v319_v40  ;;  %v920_v46 = vpack.c.bf16 %v322_v44, %v321_v43  ;;  %v394_v47 = vld [vmem:[%s1425_s3] sm:$0xff]  ;;  %v395_v48 = vld [vmem:[%s1425_s3 + $0x8] sm:$0xff]  ;;  %v396_v49 = vld [vmem:[%s1425_s3 + $0x10] sm:$0xff]  ;;  %s233_s19 = scalar_lea.vmem [#allocation3], %s1339_s18  ;;  %v575_v43 = vlaneseq (!%p776_p11)  ;;  %vm584_vm2 = vcmask (!%p776_p11), 130048  }
  0x19   : > { %903 = vmatpush3.bf16.msra.mxu0 %v902_v27  ;;  %v923_v50 = vpack.c.bf16 %v395_v48, %v394_v47  ;;  %v397_v51 = vld [vmem:[%s1425_s3 + $0x18] sm:$0xff]  ;;  %v398_v53 = vld [vmem:[%s1425_s3 + $0x20] sm:$0xff]  ;;  %v399_v54 = vld [vmem:[%s1425_s3 + $0x28] sm:$0xff]  ;;  %vm609_vm4 = vcmask (!%p776_p11), 7168   ;;  %vm638_vm5 = vcmask (!%p776_p11), 0  }
  0x1a   : > { %s240_s16 = scalar_lea.vmem %s1426_s4, %s950_s28  ;;  %904 = vmatprep.subr.bf16.mxu0 %v1108_v8  ;;  %v926_v52 = vpack.c.bf16 %v397_v51, %v396_v49  ;;  %v929_v55 = vpack.c.bf16 %v399_v54, %v398_v53  ;;  %v400_v56 = vld [vmem:[%s1425_s3 + $0x30] sm:$0xff]  ;;  %v401_v57 = vld [vmem:[%s1425_s3 + $0x38] sm:$0xff]  ;;  %v402_v59 = vld [vmem:[%s1425_s3 + $0x40] sm:$0xff]  ;;  %v576_v44 = vshrl.u32 (!%p776_p11), %v575_v43, 7  ;;  %v579_v45 = vand.u32 (!%p776_p11), 127, %v575_v43 }
  0x1b   : > { %247 = vst [vmem:[%s240_s16] sm:$0xff] %v245_v14  ;;  %248 = vst [vmem:[%s240_s16 + $0x8] sm:$0xff] %v246_v13  ;;  %924 = vmatpush3.bf16.msra.mxu1 %v923_v50  ;;  %v932_v58 = vpack.c.bf16 %v401_v57, %v400_v56  ;;  %v403_v60 = vld [vmem:[%s1425_s3 + $0x48] sm:$0xff]  ;;  %v404_v62 = vld [vmem:[%s1425_s3 + $0x50] sm:$0xff] }
  0x1c   : > { %269 = vst [vmem:[%s240_s16 + $0x10] sm:$0xff] %v267_v17  ;;  %270 = vst [vmem:[%s240_s16 + $0x18] sm:$0xff] %v268_v18  ;;  %925 = vmatprep.subr.bf16.mxu1 %v1108_v8  ;;  %v935_v61 = vpack.c.bf16 %v403_v60, %v402_v59  ;;  %v405_v63 = vld [vmem:[%s1425_s3 + $0x58] sm:$0xff]  ;;  %v406_v1 = vld [vmem:[%s1425_s3 + $0x60] sm:$0xff]  ;;  %vm580_vm1 = vcmp.eq.s32.totalorder (!%p776_p11), %v576_v44, %v579_v45 }
  0x1d   : > { %291 = vst [vmem:[%s240_s16 + $0x28] sm:$0xff] %v289_v20  ;;  %290 = vst [vmem:[%s240_s16 + $0x20] sm:$0xff] %v288_v26  ;;  %906 = vmatpush3.bf16.msra.mxu0 %v905_v30  ;;  %v938_v0 = vpack.c.bf16 %v405_v63, %v404_v62  ;;  %v407_v2 = vld [vmem:[%s1425_s3 + $0x68] sm:$0xff]  ;;  %v766_v16 = vld [vmem:[%s1423_s1] ss:$0 sm:$0xff] }
  0x1e   : > { %907 = vmatprep.subr.bf16.mxu0 %v1108_v8  ;;  %v941_v3 = vpack.c.bf16 %v407_v2, %v406_v1  ;;  %v774_v17 = vld [vmem:[%s1423_s1 + $0x2] ss:$0 sm:$0xff]  ;;  %v408_v25 = vld [vmem:[%s1425_s3 + $0x70] sm:$0xff]  ;;  %v409_v26 = vld [vmem:[%s1425_s3 + $0x78] sm:$0xff] }
  0x1f   : > { %927 = vmatpush3.bf16.msra.mxu1 %v926_v52  ;;  %v944_v27 = vpack.c.bf16 %v409_v26, %v408_v25 }
  0x20   : > { %928 = vmatprep.subr.bf16.mxu1 %v1108_v8 }
  0x21   : > { %909 = vmatpush3.bf16.msra.mxu0 %v908_v33 }
  0x22   : > { %910 = vmatprep.subr.bf16.mxu0 %v1108_v8 }
  0x23   : > { %930 = vmatpush3.bf16.msra.mxu1 %v929_v55 }
  0x24   : > { %931 = vmatprep.subr.bf16.mxu1 %v1108_v8 }
  0x25   : > { %912 = vmatpush3.bf16.msra.mxu0 %v911_v36 }
  0x26   : > { %913 = vmatprep.subr.bf16.mxu0 %v1108_v8 }
  0x27   : > { %933 = vmatpush3.bf16.msra.mxu1 %v932_v58 }
  0x28   : > { %934 = vmatprep.subr.bf16.mxu1 %v1108_v8 }
  0x29   : > { %915 = vmatpush3.bf16.msra.mxu0 %v914_v39 }
  0x2a   : > { %916 = vmatprep.subr.bf16.mxu0 %v1108_v8 }
  0x2b   : > { %936 = vmatpush3.bf16.msra.mxu1 %v935_v61 }
  0x2c   : > { %937 = vmatprep.subr.bf16.mxu1 %v1108_v8 }
  0x2d   : > { %918 = vmatpush3.bf16.msra.mxu0 %v917_v42 }
  0x2e   : > { %919 = vmatprep.subr.bf16.mxu0 %v1108_v8 }
  0x2f   : > { %939 = vmatpush3.bf16.msra.mxu1 %v938_v0 }
  0x30   : > { %940 = vmatprep.subr.bf16.mxu1 %v1108_v8 }
  0x31   : > { %921 = vmatpush3.bf16.msra.mxu0 %v920_v46  ;;  %v577_v46 = vadd.s32 (!%p776_p11), 8, %v576_v44 }
  0x33   : > { %942 = vmatpush3.bf16.msra.mxu1 %v941_v3  ;;  %vm581_vm3 = vcmp.eq.s32.totalorder (!%p776_p11), %v577_v46, %v579_v45 }
  0x34   : > { %943 = vmatprep.subr.bf16.mxu1 %v1108_v8  ;;  %v770_v8 = vld [vmem:[%s1423_s1 + $0x1] ss:$0 sm:$0xff] }
  0x37   : > { %945 = vmatpush3.bf16.msra.mxu1 %v944_v27 }
  0x9e   : > { %v251_v4 = vpop.xlane.xlu0 %250 }
  0x9f   : > { %v253_v5 = vmul.f32 0.00390625, %v251_v4 }
  0xa0   : > { %v294_v6 = vpop.xlane.xlu1 %293 }
  0xa1   : > { %v765_v7 = vadd.f32 -0.485, %v253_v5  ;;  %v295_v9 = vmul.f32 0.00390625, %v294_v6 }
  0xa2   : > { %v273_v10 = vpop.xlane.xlu0 %272 }
  0xa3   : > { %v274_v11 = vmul.f32 0.00390625, %v273_v10  ;;  %v773_v12 = vadd.f32 -0.406, %v295_v9  ;;  %v255_v13 = vmul.f32 4.366812, %v765_v7 }
  0xa5   : > { %v769_v14 = vadd.f32 -0.456, %v274_v11  ;;  %v297_v15 = vmul.f32 4.4444447, %v773_v12  ;;  %v261_v19 = vmul.f32 %v766_v16, %v255_v13 }
  0xa7   : > { %v276_v18 = vmul.f32 4.464286, %v769_v14  ;;  %v303_v21 = vmul.f32 %v774_v17, %v297_v15 }
  0xa9   : > { %v282_v20 = vmul.f32 %v770_v8, %v276_v18 }
  0xab   : > { %v283_v22 = vadd.f32 %v282_v20, %v261_v19 }
  0xad   : > { %v304_v23 = vadd.f32 %v303_v21, %v283_v22 }
  0xaf   : > { %v305_v24 = vmax.f32 %v304_v23, 0.0 }
  0xb1   : > { %306 = vst [vmem:[%s233_s19] sm:$0xff] %v305_v24  ;;  %854 = vmatmul.mubr.f32.vlgmr.msra.gmra.mrb[0].mxu0 %v305_v24 }
 0x184   : > { %v389_v28 = vpop.f32.mrb[0].mxu0 }
 0x185   : > { %v393_v29 = vmax.f32 %v389_v28, 0.0  ;;  %v855_v30 = vpop.f32.mrb[1].mxu0 }
 0x187   : > { %889 = vmatmul.mubr.f32.vlgmr.msra.gmra.mrb[0].mxu1 %v393_v29 }
 0x25a   : > { %v476_v31 = vpop.f32.mrb[0].mxu1 }
 0x25b   : > { %v890_v32 = vpop.f32.mrb[1].mxu1  ;;  %v480_v33 = vmul.f32 %v476_v31, %v476_v31 }
 0x25d   : > { %481 = vadd.xlane.f32.xlu1 %v480_v33 }
 0x2ea   : > { %v482_v34 = vpop.xlane.xlu1 %481 }
 0x2eb   : > { %v483_v35 = vmax.f32 %v482_v34, 1e-16 }
 0x2ed   : > { %1004 = vrsqrt.f32 %v483_v35 }
 0x2f4   : > { %492 = sbr.rel (%p776_p11) target bundleno = 1530 (0x5fa), region = 40 }
 0x2f7   : > { %v1005_v36 = vpop.eup %1004 }
 0x2f8   : > { %v485_v37 = vmul.f32 %v1005_v36, %v476_v31 }
 0x2fa   : > { %488 = vst [vmem:[%s487_s10] sm:$0xff] %v485_v37 }
 0x301   : > { %v493_v38 = vld [vmem:[#allocation2] sm:$0xff]  ;;  %v494_v39 = vld [vmem:[#allocation2 + $0x8] sm:$0xff] }
 0x302   : > { %v946_v40 = vpack.c.bf16 %v494_v39, %v493_v38  ;;  %v495_v41 = vmul.f32 2.0, %v493_v38  ;;  %v496_v42 = vmul.f32 2.0, %v494_v39 }
 0x304   : > { %947 = vmatprep.subr.bf16.mxu0 %v946_v40  ;;  %895 = vmatprep.mubr.f32.mxu0 %v495_v41  ;;  %v572_v53 = vmul.f32 %v495_v41, %v494_v39 }
 0x305   : > { %949 = vmatpush3.bf16.xpose.msra.mxu0 %v946_v40 }
 0x30c   : > { %896 = vmatmul.mubr.f32.vlgmr.msra.gmra.mrb[0].mxu0 %v496_v42 }
 0x3df   : > { %v897_v47 = vpop.f32.mrb[0].mxu0 }
 0x3e0   : > { %v563_v48 = vpop.f32.mrb[1].mxu0  ;;  %v583_v51 = vsel %vm581_vm3, -inf, %v897_v47 }
 0x3e1   : > { %v582_v49 = vsel %vm580_vm1, -inf, %v563_v48  ;;  %v588_v52 = vsel %vm584_vm2, %v583_v51, -inf }
 0x3e2   : > { %v585_v50 = vsel %vm584_vm2, %v582_v49, -inf }
 0x3e3   : > { %586 = vmax.xlane.f32.xlu0 %v585_v50 }
 0x3e7   : > { %589 = vmax.xlane.f32.xlu0 %v588_v52 }
 0x3eb   : > { %573 = vadd.xlane.f32.xlu0 %v572_v53 }
 0x470   : > { %v587_v54 = vpop.xlane.xlu0 %586 }
 0x471   : > { %v591_v55 = vsub.f32 %v582_v49, %v587_v54 }
 0x473   : > { %v593_v56 = vmul.f32 1.442695, %v591_v55 }
 0x474   : > { %v590_v57 = vpop.xlane.xlu0 %589 }
 0x475   : > { %1006 = vpow2.f32 %v593_v56  ;;  %v592_v58 = vsub.f32 %v583_v51, %v590_v57 }
 0x477   : > { %v595_v59 = vmul.f32 1.442695, %v592_v58 }
 0x478   : > { %v574_v0 = vpop.xlane.xlu0 %573 }
 0x479   : > { %1008 = vpow2.f32 %v595_v59  ;;  %v623_v1 = vsel %vm609_vm4, %v574_v0, 0.0 }
 0x47a   : > { %624 = vadd.xlane.f32.xlu0 %v623_v1 }
 0x47f   : > { %v1007_v60 = vpop.eup %1006 }
 0x480   : > { %v597_v61 = vsel %vm584_vm2, %v1007_v60, 0.0 }
 0x481   : > { %598 = vadd.xlane.f32.xlu1 %v597_v61 }
 0x483   : > { %v1009_v62 = vpop.eup %1008 }
 0x484   : > { %v600_v63 = vsel %vm584_vm2, %v1009_v62, 0.0 }
 0x485   : > { %601 = vadd.xlane.f32.xlu1 %v600_v63 }
 0x507   : > { %v625_v14 = vpop.xlane.xlu0 %624 }
 0x508   : > { %v626_v15 = vrot.slane %v625_v14, 4 }
 0x50a   : > { %v627_v16 = vadd.f32 %v626_v15, %v625_v14 }
 0x50c   : > { %v628_v8 = vrot.slane %v627_v16, 2 }
 0x50e   : > { %v599_v2 = vpop.xlane.xlu1 %598  ;;  %v629_v20 = vadd.f32 %v628_v8, %v627_v16 }
 0x50f   : > { %1010 = vlog2.f32 %v599_v2 }
 0x510   : > { %v630_v23 = vrot.slane %v629_v20, 1 }
 0x512   : > { %v602_v3 = vpop.xlane.xlu1 %601  ;;  %v631_v26 = vadd.f32 %v630_v23, %v629_v20 }
 0x513   : > { %1012 = vlog2.f32 %v602_v3 }
 0x519   : > { %v1011_v4 = vpop.eup %1010 }
 0x51a   : > { %v604_v5 = vmul.f32 0.6931472, %v1011_v4 }
 0x51c   : > { %v607_v9 = vadd.f32 %v604_v5, %v587_v54 }
 0x51d   : > { %v1013_v6 = vpop.eup %1012 }
 0x51e   : > { %v606_v7 = vmul.f32 0.6931472, %v1013_v6  ;;  %v610_v11 = vsel %vm609_vm4, %v607_v9, 0.0 }
 0x520   : > { %v608_v10 = vadd.f32 %v606_v7, %v590_v57 }
 0x522   : > { %v611_v12 = vsel %vm609_vm4, %v608_v10, 0.0 }
 0x523   : > { %v612_v13 = vadd.f32 %v611_v12, %v610_v11 }
 0x525   : > { %613 = vadd.xlane.f32.xlu1 %v612_v13 }
 0x5b2   : > { %v614_v17 = vpop.xlane.xlu1 %613 }
 0x5b3   : > { %v615_v18 = vrot.slane %v614_v17, 4 }
 0x5b5   : > { %v616_v19 = vadd.f32 %v615_v18, %v614_v17 }
 0x5b7   : > { %v617_v21 = vrot.slane %v616_v19, 2 }
 0x5b9   : > { %v618_v22 = vadd.f32 %v617_v21, %v616_v19 }
 0x5bb   : > { %v619_v24 = vrot.slane %v618_v22, 1 }
 0x5bd   : > { %v620_v25 = vadd.f32 %v619_v24, %v618_v22 }
 0x5bf   : > { %951 = vpush %v620_v25 }
 0x5c0   : > { %953 = vpush %v631_v26 }
 0x5f0   : > { %s952_s11 = spop %951 }
 0x5f1   : > { %s954_s12 = spop %953  ;;  %v622_v29 = vstv %s952_s11 }
 0x5f2   : > { %v633_v27 = vstv %s954_s12 }
 0x5f3   : > { %v634_v28 = vmul.f32 2.0, %v633_v27 }
 0x5f5   : > { %v635_v30 = vsub.f32 %v622_v29, %v634_v28 }
 0x5f7   : > { %v637_v31 = vmul.f32 0.0625, %v635_v30 }
 0x5f9   : > { %639 = vst.msk [vmem:[#allocation5] sm:$0x1] %vm638_vm5, %v637_v31 }
 0x5fa PF: > { %s778_s13 = sshll.u32 %s1169_s25, 7  ;;  %s662_s20 = sshll.u32 %s233_s19, 4  ;;  %s663_s20 = int_to_ptr.vmem [resolvable:$true] %s662_s20 }
 0x5fb   : > { %s1360_s16 = scalar_lea.hbm %s1427_s5, %s778_s13  ;;  %s646_s26 = scalar_lea.sflag [#allocation4], %s231_s17 }
 0x5fc   : > { %s1014_s28 = scalar_lea.vmem %s663_s20, 128  ;;  %s1111_s29 = smov [#allocation3]  }
 0x5fd   : > { %p1015_p12 = scmp.ne.s32.totalorder %s663_s20, %s1014_s28  ;;  %s1018_s9 = sshll.u32 %s1111_s29, 4  ;;  %s1019_s9 = int_to_ptr.vmem [resolvable:$false] %s1018_s9 }
 0x5fe   : > { %s1020_s10 = scalar_lea.vmem %s1019_s9, 256  ;;  %p1021_p1 = scmp.lt.s32.totalorder %s663_s20, %s1019_s9 }
 0x5ff   : > { %p1016_p13 = pnand %p1015_p12, %p1188_p5  ;;  %p1022_p3 = scmp.lt.s32.totalorder %s1020_s10, %s1014_s28 }
 0x601   : > { %p1017_p0 = pneg %p1016_p13  ;;  %p1023_p4 = por %p1022_p3, %p1021_p1 }
 0x603   : > { %p1024_p7 = pnand %p1023_p4, %p1017_p0 }
 0x605   : > { %1027 = shalt.err (!%p1024_p7)
}
 0x606   : > { %s1028_s17 = scalar_lea.hbm %s1360_s16, 128  ;;  %s1032_s11 = scalar_lea.hbm %s1427_s5, 256 }
 0x607   : > { %p1029_p8 = scmp.ne.s32.totalorder %s1360_s16, %s1028_s17  ;;  %p1033_p11 = scmp.lt.u32.totalorder %s1360_s16, %s1427_s5 }
 0x608   : > { %p1034_p12 = scmp.lt.u32.totalorder %s1032_s11, %s1028_s17  ;;  %p1036_p0 = scmp.lt.u32.totalorder %s1028_s17, %s1360_s16 }
 0x609   : > { %p1030_p9 = pnand %p1029_p8, %p1188_p5 }
 0x60a   : > { %p1035_p13 = por %p1034_p12, %p1033_p11 }
 0x60b   : > { %p1031_p10 = pneg %p1030_p9 }
 0x60c   : > { %p1037_p1 = por %p1036_p0, %p1035_p13 }
 0x60e   : > { %p1038_p3 = pnand %p1037_p1, %p1031_p10 }
 0x610   : > { %1041 = shalt.err (!%p1038_p3)
}
 0x611   : > { %955 = dma.vmem_to_hbm [thread:$0]  (%p1188_p5), %s663_s20, 128, %s1360_s16, %s646_s26  }
 0x612   : > { %s1112_s14 = smov [#allocation5]  }
 0x613   : > { %s673_s15 = sshll.u32 %s1112_s14, 4  ;;  %s674_s15 = int_to_ptr.vmem [resolvable:$true] %s673_s15 }
 0x614   : > { %s1042_s28 = scalar_lea.vmem %s674_s15, 16  ;;  %s1048_s29 = scalar_lea.vmem %s674_s15, 32 }
 0x615   : > { %p1043_p4 = scmp.ne.s32.totalorder %s674_s15, %s1042_s28  ;;  %p1049_p9 = scmp.lt.s32.totalorder %s674_s15, %s674_s15 }
 0x616   : > { %p1050_p11 = scmp.lt.s32.totalorder %s1048_s29, %s1042_s28 }
 0x617   : > { %p1044_p7 = pnand %p1043_p4, %p149_p2 }
 0x618   : > { %p1051_p12 = por %p1050_p11, %p1049_p9 }
 0x619   : > { %p1045_p8 = pneg %p1044_p7 }
 0x61b   : > { %p1052_p13 = pnand %p1051_p12, %p1045_p8 }
 0x61d   : > { %1055 = shalt.err (!%p1052_p13)
}
 0x61e   : > { %s1056_s7 = scalar_lea.hbm %s1428_s6, 16 }
 0x61f   : > { %p1057_p5 = scmp.ne.s32.totalorder %s1428_s6, %s1056_s7  ;;  %p1062_p1 = scmp.lt.u32.totalorder %s1056_s7, %s1428_s6 }
 0x621   : > { %p1058_p10 = pnand %p1057_p5, %p149_p2 }
 0x623   : > { %p1059_p0 = pneg %p1058_p10 }
 0x625   : > { %p1064_p3 = pnand %p1062_p1, %p1059_p0 }
 0x627   : > { %1067 = shalt.err (!%p1064_p3)
}
 0x628   : > { %957 = dma.vmem_to_hbm [thread:$0]  (%p149_p2), %s674_s15, 16, %s1428_s6, [#allocation6]  }
 0x629   : > { %1085 = dma.done.wait (%p149_p2), [#allocation6], 16  }
 0x62a   : > { %1087 = vsyncadd (%p149_p2), [#allocation6], 4294967280 }
 0x62b PF: > { %p967_p4 = scmp.ge.s32.totalorder %s1106_s24, 2  ;;  %s697_s11 = sand.u32 1, %s1094_s21  }
 0x62c   : > { %s698_s12 = scalar_lea.sflag [#allocation4], %s697_s11 }
 0x62d   : > { %p962_p7 = pnand %p967_p4, %p1192_p6 }
 0x62f   : > { %1089 = dma.done.wait (!%p962_p7), %s698_s12, 128  }
 0x630   : > { %1091 = vsyncadd (!%p962_p7), %s698_s12, 4294967168  ;;  %p18_p8 = scmp.ge.s32.totalorder %s1173_s27, 4   ;;  %s1431_s21 = smov %s1098_s22 }
 0x631   : > { %s1432_s22 = smov %s1102_s23  ;;  %s1433_s23 = smov %s1184_s30 }
 0x632   : > { %s1434_s24 = smov %s1173_s27  ;;  %20 = sbr.rel (!%p18_p8) target bundleno = 4 (0x4), region = 93 }
 0x639   :  { %703 = vsyncpa [#allocation4], 1 }
 0x63a   :  { %705 = vsyncpa [#allocation4 + $0x1], 1 }
 0x63b   :  { %706 = vsyncpa [#allocation6], 1 }

</bundles_post_ra>
